<compile_context>
chip_gen: v7x
topology: tpu7x:2x2x1
jax: 0.10.0
libtpu: 0.0.40
codegen_flags: <defaults>
</compile_context>

<pallas_src>
import functools

import jax
import jax.numpy as jnp
from jax.experimental import pallas as pl
from jax.experimental.pallas import tpu as pltpu

ALPHA = 0.1          # GCNII initial-residual mixing coefficient (fixed)
LN_EPS = 1e-5        # nn.LayerNorm default eps


def _gsnet_block_kernel(xt_ref, x0t_ref, adj_ref, w_ref, m_ref,
                        bias_ref, gamma_ref, betaln_ref, o_ref, *, eps):
    # xt_ref : (J, B*Cin)  bf16   x laid out nodes x (batch*channels)
    # x0t_ref: (J, B*Cin)  f32
    # adj_ref: (J, J)      bf16   pre-scaled by (1 - alpha)
    # w_ref  : (B*Cin, B*Cout) bf16  block-diag of W_eff = (1-beta)I + beta*W
    # m_ref  : (B*Cout, B*Cout) f32  block-diag averaging matrix (1/Cout blocks)
    # bias/gamma/betaln: (1, B*Cout) f32 (tiled over batch)

    # Graph aggregation on the MXU; (1-alpha) already folded into adj.
    agg = jnp.dot(adj_ref[...], xt_ref[...], preferred_element_type=jnp.float32)
    h = agg + ALPHA * x0t_ref[...]                               # initial residual, f32

    # Identity-mapped weight matmul; batch handled by the block-diagonal weight.
    y = jnp.dot(h.astype(jnp.bfloat16), w_ref[...],
                preferred_element_type=jnp.float32) + bias_ref[...]   # (J, B*Cout)

    # LayerNorm over each Cout segment (per node, per batch element).
    # Segment mean / mean-of-squares via block-diagonal averaging matmuls:
    # keeps everything lane-dense, no cross-lane reshapes.
    mean = jnp.dot(y, m_ref[...], preferred_element_type=jnp.float32)
    yc = y - mean
    var = jnp.dot(yc * yc, m_ref[...], preferred_element_type=jnp.float32)
    inv = jax.lax.rsqrt(var + eps)

    o_ref[...] = (yc * inv * gamma_ref[...] + betaln_ref[...]).astype(o_ref.dtype)


def graph_conv_block_i(x, x0, adj, w, bias, ln_gamma, ln_beta, *,
                       beta, p_dropout=None, eps=LN_EPS):
    """Pallas forward of GraphConvBlockI.

    x, x0 : (B, J, C_in)   adj : (J, J)   w : (C_in, C_out)
    bias, ln_gamma, ln_beta : (C_out,)
    Returns (B, J, C_out).
    """
    B, J, Cin = x.shape
    Cout = w.shape[1]

    # ---- Fold scalar blends into parameters (O(J^2)+O(C^2), once per call). ----
    adj_s = ((1.0 - ALPHA) * adj).astype(jnp.bfloat16)                       # (J, J)
    w_eff = (1.0 - beta) * jnp.eye(Cin, Cout, dtype=jnp.float32) + beta * w  # (Cin, Cout)
    # Batch folded into lanes -> block-diagonal weight handles all B in one matmul.
    w_big = jnp.kron(jnp.eye(B, dtype=jnp.float32), w_eff).astype(jnp.bfloat16)
    # Block-diagonal averaging matrix for per-(node, batch) LayerNorm statistics.
    m_seg = jnp.kron(jnp.eye(B, dtype=jnp.float32),
                     jnp.full((Cout, Cout), 1.0 / Cout, dtype=jnp.float32))

    # ---- Layout plumbing (outside the kernel): (B, J, C) -> (J, B*C). ----
    xt = jnp.transpose(x, (1, 0, 2)).reshape(J, B * Cin).astype(jnp.bfloat16)
    x0t = jnp.transpose(x0, (1, 0, 2)).reshape(J, B * Cin).astype(jnp.float32)

    bias_b = jnp.tile(bias.reshape(1, Cout).astype(jnp.float32), (1, B))
    gamma_b = jnp.tile(ln_gamma.reshape(1, Cout).astype(jnp.float32), (1, B))
    betaln_b = jnp.tile(ln_beta.reshape(1, Cout).astype(jnp.float32), (1, B))

    kernel = functools.partial(_gsnet_block_kernel, eps=float(eps))

    out2d = pl.pallas_call(
        kernel,
        out_shape=jax.ShapeDtypeStruct((J, B * Cout), x.dtype),
        grid_spec=pltpu.PrefetchScalarGridSpec(
            num_scalar_prefetch=0,
            grid=(1,),                                           # single fused step
            in_specs=[
                pl.BlockSpec((J, B * Cin), lambda i: (0, 0)),        # x   (bf16)
                pl.BlockSpec((J, B * Cin), lambda i: (0, 0)),        # x0  (f32)
                pl.BlockSpec((J, J), lambda i: (0, 0)),              # adj_s (bf16)
                pl.BlockSpec((B * Cin, B * Cout), lambda i: (0, 0)), # W_big (bf16)
                pl.BlockSpec((B * Cout, B * Cout), lambda i: (0, 0)),# m_seg (f32)
                pl.BlockSpec((1, B * Cout), lambda i: (0, 0)),       # bias
                pl.BlockSpec((1, B * Cout), lambda i: (0, 0)),       # LN gamma
                pl.BlockSpec((1, B * Cout), lambda i: (0, 0)),       # LN beta
            ],
            out_specs=pl.BlockSpec((J, B * Cout), lambda i: (0, 0)),
        ),
        compiler_params=pltpu.CompilerParams(
            dimension_semantics=("arbitrary",)),
    )(xt, x0t, adj_s, w_big, m_seg, bias_b, gamma_b, betaln_b)

    # (J, B*Cout) -> (B, J, Cout)
    out = jnp.transpose(out2d.reshape(J, B, Cout), (1, 0, 2))
    # p_dropout: eval-mode dropout is identity.
    return out


def _reference(x, x0, adj, w, bias, ln_gamma, ln_beta, *, beta, eps=LN_EPS):
    agg = jnp.einsum("ij,bjc->bic", adj, x)
    h = (1.0 - ALPHA) * agg + ALPHA * x0
    y = (1.0 - beta) * h + beta * jnp.einsum("bjc,cd->bjd", h, w) + bias
    mean = jnp.mean(y, axis=-1, keepdims=True)
    var = jnp.mean((y - mean) ** 2, axis=-1, keepdims=True)
    out = (y - mean) / jnp.sqrt(var + eps) * ln_gamma + ln_beta
    return out  # dropout: eval-mode identity


def _normalized_adjacency(num_nodes):
    # Deterministic chain graph + self loops, symmetrically normalized.
    a = jnp.eye(num_nodes, dtype=jnp.float32)
    idx = jnp.arange(num_nodes - 1)
    a = a.at[idx, idx + 1].set(1.0)
    a = a.at[idx + 1, idx].set(1.0)
    deg = jnp.sum(a, axis=1)
    d_inv_sqrt = 1.0 / jnp.sqrt(deg)
    return a * d_inv_sqrt[:, None] * d_inv_sqrt[None, :]


if __name__ == "__main__":
    B, J, C = 2, 16, 32   # batch, graph nodes (e.g. joints), hidden dim
    beta = 0.3
    p_dropout = 0.25      # treated as eval-mode identity

    key = jax.random.PRNGKey(0)
    kx, kx0, kw, kb, kg, kbl = jax.random.split(key, 6)
    x = jax.random.normal(kx, (B, J, C), dtype=jnp.float32)
    x0 = jax.random.normal(kx0, (B, J, C), dtype=jnp.float32)
    # Deterministic synthetic parameters (not a checkpoint).
    w = jax.random.uniform(kw, (C, C), dtype=jnp.float32,
                           minval=-(C ** -0.5), maxval=(C ** -0.5))
    bias = jax.random.uniform(kb, (C,), dtype=jnp.float32,
                              minval=-(C ** -0.5), maxval=(C ** -0.5))
    ln_gamma = 1.0 + 0.1 * jax.random.normal(kg, (C,), dtype=jnp.float32)
    ln_beta = 0.1 * jax.random.normal(kbl, (C,), dtype=jnp.float32)
    adj = _normalized_adjacency(J)

    out = graph_conv_block_i(x, x0, adj, w, bias, ln_gamma, ln_beta,
                             beta=beta, p_dropout=p_dropout)
    out = jax.block_until_ready(out)

    ref = _reference(x, x0, adj, w, bias, ln_gamma, ln_beta, beta=beta)
    assert out.shape == (B, J, C)
    rel = float(jnp.linalg.norm(out - ref) / jnp.linalg.norm(ref))
    # bf16 MXU operands vs f32 reference -> compare with a relative L2 bound.
    assert rel < 3e-2, f"relative L2 error too large: {rel}"

    print("KERNEL_OK")
</pallas_src>

<mosaic_0001>
module attributes {stable_mosaic.version = 11 : i64} {
  func.func @_gsnet_block_kernel(%arg0: i32, %arg1: memref<16x64xbf16, #tpu.memory_space<vmem>>, %arg2: memref<16x64xf32, #tpu.memory_space<vmem>>, %arg3: memref<16x16xbf16, #tpu.memory_space<vmem>>, %arg4: memref<64x64xbf16, #tpu.memory_space<vmem>>, %arg5: memref<64x64xf32, #tpu.memory_space<vmem>>, %arg6: memref<1x64xf32, #tpu.memory_space<vmem>>, %arg7: memref<1x64xf32, #tpu.memory_space<vmem>>, %arg8: memref<1x64xf32, #tpu.memory_space<vmem>>, %arg9: memref<16x64xf32, #tpu.memory_space<vmem>>) attributes {dimension_semantics = [#tpu.dimension_semantics<arbitrary>], iteration_bounds = array<i64: 1>, scalar_prefetch = 0 : i64, scratch_operands = 0 : i64, tpu.core_type = #tpu.core_type<tc>, window_params = [{pipeline_mode = #tpu.pipeline_mode<synchronous>, transform_indices = @transform_0, window_bounds = array<i64: 16, 64>}, {pipeline_mode = #tpu.pipeline_mode<synchronous>, transform_indices = @transform_1, window_bounds = array<i64: 16, 64>}, {pipeline_mode = #tpu.pipeline_mode<synchronous>, transform_indices = @transform_2, window_bounds = array<i64: 16, 16>}, {pipeline_mode = #tpu.pipeline_mode<synchronous>, transform_indices = @transform_3, window_bounds = array<i64: 64, 64>}, {pipeline_mode = #tpu.pipeline_mode<synchronous>, transform_indices = @transform_4, window_bounds = array<i64: 64, 64>}, {pipeline_mode = #tpu.pipeline_mode<synchronous>, transform_indices = @transform_5, window_bounds = array<i64: 1, 64>}, {pipeline_mode = #tpu.pipeline_mode<synchronous>, transform_indices = @transform_6, window_bounds = array<i64: 1, 64>}, {pipeline_mode = #tpu.pipeline_mode<synchronous>, transform_indices = @transform_7, window_bounds = array<i64: 1, 64>}, {pipeline_mode = #tpu.pipeline_mode<synchronous>, transform_indices = @transform_8, window_bounds = array<i64: 16, 64>}]} {
    %c0 = arith.constant 0 : index
    %c0_0 = arith.constant 0 : index
    %0 = vector.load %arg3[%c0, %c0_0] : memref<16x16xbf16, #tpu.memory_space<vmem>>, vector<16x16xbf16>
    %c0_1 = arith.constant 0 : index
    %c0_2 = arith.constant 0 : index
    %1 = vector.load %arg1[%c0_1, %c0_2] : memref<16x64xbf16, #tpu.memory_space<vmem>>, vector<16x64xbf16>
    %cst = arith.constant dense<0.000000e+00> : vector<16x64xf32>
    %2 = tpu.matmul %0, %1, %cst {dimension_numbers = #tpu.dot_dimension_numbers<[1], [0], [0], [1], [0, 0, 1, 1], [], []>} : vector<16x16xbf16>, vector<16x64xbf16>, vector<16x64xf32> -> vector<16x64xf32>
    %c0_3 = arith.constant 0 : index
    %c0_4 = arith.constant 0 : index
    %3 = vector.load %arg2[%c0_3, %c0_4] : memref<16x64xf32, #tpu.memory_space<vmem>>, vector<16x64xf32>
    %cst_5 = arith.constant 1.000000e-01 : f32
    %4 = vector.broadcast %cst_5 : f32 to vector<16x64xf32>
    %5 = arith.mulf %4, %3 : vector<16x64xf32>
    %6 = arith.addf %2, %5 : vector<16x64xf32>
    %7 = arith.truncf %6 : vector<16x64xf32> to vector<16x64xbf16>
    %c0_6 = arith.constant 0 : index
    %c0_7 = arith.constant 0 : index
    %8 = vector.load %arg4[%c0_6, %c0_7] : memref<64x64xbf16, #tpu.memory_space<vmem>>, vector<64x64xbf16>
    %cst_8 = arith.constant dense<0.000000e+00> : vector<16x64xf32>
    %9 = tpu.matmul %7, %8, %cst_8 {dimension_numbers = #tpu.dot_dimension_numbers<[1], [0], [0], [1], [0, 0, 1, 1], [], []>} : vector<16x64xbf16>, vector<64x64xbf16>, vector<16x64xf32> -> vector<16x64xf32>
    %c0_9 = arith.constant 0 : index
    %c0_10 = arith.constant 0 : index
    %10 = vector.load %arg6[%c0_9, %c0_10] : memref<1x64xf32, #tpu.memory_space<vmem>>, vector<1x64xf32>
    %11 = vector.broadcast %10 : vector<1x64xf32> to vector<16x64xf32>
    %12 = arith.addf %9, %11 : vector<16x64xf32>
    %c0_11 = arith.constant 0 : index
    %c0_12 = arith.constant 0 : index
    %13 = vector.load %arg5[%c0_11, %c0_12] : memref<64x64xf32, #tpu.memory_space<vmem>>, vector<64x64xf32>
    %cst_13 = arith.constant dense<0.000000e+00> : vector<16x64xf32>
    %14 = tpu.matmul %12, %13, %cst_13 {dimension_numbers = #tpu.dot_dimension_numbers<[1], [0], [0], [1], [0, 0, 1, 1], [], []>} : vector<16x64xf32>, vector<64x64xf32>, vector<16x64xf32> -> vector<16x64xf32>
    %15 = arith.subf %12, %14 : vector<16x64xf32>
    %16 = arith.mulf %15, %15 : vector<16x64xf32>
    %c0_14 = arith.constant 0 : index
    %c0_15 = arith.constant 0 : index
    %17 = vector.load %arg5[%c0_14, %c0_15] : memref<64x64xf32, #tpu.memory_space<vmem>>, vector<64x64xf32>
    %cst_16 = arith.constant dense<0.000000e+00> : vector<16x64xf32>
    %18 = tpu.matmul %16, %17, %cst_16 {dimension_numbers = #tpu.dot_dimension_numbers<[1], [0], [0], [1], [0, 0, 1, 1], [], []>} : vector<16x64xf32>, vector<64x64xf32>, vector<16x64xf32> -> vector<16x64xf32>
    %cst_17 = arith.constant 9.99999974E-6 : f32
    %19 = vector.broadcast %cst_17 : f32 to vector<16x64xf32>
    %20 = arith.addf %18, %19 : vector<16x64xf32>
    %21 = math.rsqrt %20 : vector<16x64xf32>
    %22 = arith.mulf %15, %21 : vector<16x64xf32>
    %c0_18 = arith.constant 0 : index
    %c0_19 = arith.constant 0 : index
    %23 = vector.load %arg7[%c0_18, %c0_19] : memref<1x64xf32, #tpu.memory_space<vmem>>, vector<1x64xf32>
    %24 = vector.broadcast %23 : vector<1x64xf32> to vector<16x64xf32>
    %25 = arith.mulf %22, %24 : vector<16x64xf32>
    %c0_20 = arith.constant 0 : index
    %c0_21 = arith.constant 0 : index
    %26 = vector.load %arg8[%c0_20, %c0_21] : memref<1x64xf32, #tpu.memory_space<vmem>>, vector<1x64xf32>
    %27 = vector.broadcast %26 : vector<1x64xf32> to vector<16x64xf32>
    %28 = arith.addf %25, %27 : vector<16x64xf32>
    %c0_22 = arith.constant 0 : index
    %c0_23 = arith.constant 0 : index
    %29 = vector.load %arg9[%c0_22, %c0_23] : memref<16x64xf32, #tpu.memory_space<vmem>>, vector<16x64xf32>
    tpu.vector_store %arg9[%c0_22, %c0_23], %28 {strides = array<i32>} : memref<16x64xf32, #tpu.memory_space<vmem>>, vector<16x64xf32>,
    return
  }
  func.func @transform_0(%arg0: i32) -> (i32, i32) {
    %c0_i32 = arith.constant 0 : i32
    %c0_i32_0 = arith.constant 0 : i32
    %c0_i32_1 = arith.constant 0 : i32
    return %c0_i32, %c0_i32_0 : i32, i32
  }
  func.func @transform_1(%arg0: i32) -> (i32, i32) {
    %c0_i32 = arith.constant 0 : i32
    %c0_i32_0 = arith.constant 0 : i32
    %c0_i32_1 = arith.constant 0 : i32
    return %c0_i32, %c0_i32_0 : i32, i32
  }
  func.func @transform_2(%arg0: i32) -> (i32, i32) {
    %c0_i32 = arith.constant 0 : i32
    %c0_i32_0 = arith.constant 0 : i32
    %c0_i32_1 = arith.constant 0 : i32
    return %c0_i32, %c0_i32_0 : i32, i32
  }
  func.func @transform_3(%arg0: i32) -> (i32, i32) {
    %c0_i32 = arith.constant 0 : i32
    %c0_i32_0 = arith.constant 0 : i32
    %c0_i32_1 = arith.constant 0 : i32
    return %c0_i32, %c0_i32_0 : i32, i32
  }
  func.func @transform_4(%arg0: i32) -> (i32, i32) {
    %c0_i32 = arith.constant 0 : i32
    %c0_i32_0 = arith.constant 0 : i32
    %c0_i32_1 = arith.constant 0 : i32
    return %c0_i32, %c0_i32_0 : i32, i32
  }
  func.func @transform_5(%arg0: i32) -> (i32, i32) {
    %c0_i32 = arith.constant 0 : i32
    %c0_i32_0 = arith.constant 0 : i32
    %c0_i32_1 = arith.constant 0 : i32
    return %c0_i32, %c0_i32_0 : i32, i32
  }
  func.func @transform_6(%arg0: i32) -> (i32, i32) {
    %c0_i32 = arith.constant 0 : i32
    %c0_i32_0 = arith.constant 0 : i32
    %c0_i32_1 = arith.constant 0 : i32
    return %c0_i32, %c0_i32_0 : i32, i32
  }
  func.func @transform_7(%arg0: i32) -> (i32, i32) {
    %c0_i32 = arith.constant 0 : i32
    %c0_i32_0 = arith.constant 0 : i32
    %c0_i32_1 = arith.constant 0 : i32
    return %c0_i32, %c0_i32_0 : i32, i32
  }
  func.func @transform_8(%arg0: i32) -> (i32, i32) {
    %c0_i32 = arith.constant 0 : i32
    %c0_i32_0 = arith.constant 0 : i32
    %c0_i32_1 = arith.constant 0 : i32
    return %c0_i32, %c0_i32_0 : i32, i32
  }
}

</mosaic_0001>

<bundles_post_ra>
// kernel: tpu_custom_call.1
= control target key start
LH: loop header
LB: loop body
LE: loop exit
PB: predicated region body
PF: predicated region fallthrough
CT: control target
= control target key end

     0   :  { %13 = vsyncpa [#allocation3], 0  ;;  %s920_s0 = inlined_call_operand.hbm [shape: bf16[16,64], index: 0, kind: input, shape index: {}]   ;;  %s921_s1 = inlined_call_operand.hbm [shape: f32[16,64], index: 1, kind: input, shape index: {}]   ;;  %s922_s2 = inlined_call_operand.hbm [shape: bf16[16,16], index: 2, kind: input, shape index: {}]   ;;  %s923_s3 = inlined_call_operand.hbm [shape: bf16[64,64], index: 3, kind: input, shape index: {}]   ;;  %s924_s4 = inlined_call_operand.hbm [shape: f32[64,64], index: 4, kind: input, shape index: {}]   ;;  %s925_s5 = inlined_call_operand.vmem [shape: f32[1,64], index: 5, kind: input, shape index: {}]   ;;  %s926_s6 = inlined_call_operand.vmem [shape: f32[1,64], index: 6, kind: input, shape index: {}]   ;;  %s927_s7 = inlined_call_operand.vmem [shape: f32[1,64], index: 7, kind: input, shape index: {}]   ;;  %s928_s8 = inlined_call_operand.hbm [shape: f32[16,64], index: 8, kind: output, shape index: {}]  }
   0x1   :  { %14 = vsyncpa [#allocation6], 0 }
   0x2   :  { %15 = vsyncpa [#allocation9], 0 }
   0x3   :  { %16 = vsyncpa [#allocation4], 0  ;;  %s757_s27 = smov [#allocation5]   ;;  %s617_s9 = scalar_lea.hbm %s921_s1, 256 }
   0x4   :  { %s34_s28 = sshll.u32 %s757_s27, 4  ;;  %p618_p0 = scmp.ne.s32.totalorder %s921_s1, %s617_s9  ;;  %s35_s28 = int_to_ptr.vmem [resolvable:$true] %s34_s28 }
   0x5   :  { %p621_p1 = scmp.lt.u32.totalorder %s617_s9, %s921_s1 }
   0x7   :  { %p623_p2 = pnand %p621_p1, %p618_p0 }
   0x9   :  { %626 = shalt.err (!%p623_p2)
}
   0xa   :  { %s627_s14 = scalar_lea.vmem %s35_s28, 256  ;;  %p632_p4 = scmp.lt.s32.totalorder %s35_s28, %s35_s28 }
   0xb   :  { %p628_p3 = scmp.ne.s32.totalorder %s35_s28, %s627_s14  ;;  %p633_p5 = scmp.lt.s32.totalorder %s627_s14, %s627_s14 }
   0xd   :  { %p634_p6 = por %p633_p5, %p632_p4 }
   0xf   :  { %p635_p7 = pnand %p634_p6, %p628_p3 }
  0x11   :  { %638 = shalt.err (!%p635_p7)
}
  0x12   :  { %s758_s15 = smov 128   ;;  %s759_s16 = smov 8  }
  0x13   :  { %40 = dma.hbm_to_vmem [thread:$0]  %s921_s1, 256, %s35_s28, [#allocation6], %s758_s15, %s758_s15, %s759_s16  }
  0x14   :  { %s760_s19 = smov [#allocation8]   ;;  %s761_s21 = smov [#allocation2]  }
  0x15   :  { %s58_s20 = sshll.u32 %s760_s19, 4  ;;  %s22_s22 = sshll.u32 %s761_s21, 4  ;;  %s59_s20 = int_to_ptr.vmem [resolvable:$true] %s58_s20  ;;  %s23_s22 = int_to_ptr.vmem [resolvable:$true] %s22_s22 }
  0x16   :  { %s639_s25 = scalar_lea.hbm %s923_s3, 512 }
  0x17   :  { %p640_p8 = scmp.ne.s32.totalorder %s923_s3, %s639_s25  ;;  %p643_p9 = scmp.lt.u32.totalorder %s639_s25, %s923_s3 }
  0x19   :  { %p645_p10 = pnand %p643_p9, %p640_p8 }
  0x1b   :  { %648 = shalt.err (!%p645_p10)
}
  0x1c   :  { %s649_s1 = scalar_lea.vmem %s59_s20, 512  ;;  %p654_p12 = scmp.lt.s32.totalorder %s59_s20, %s59_s20 }
  0x1d   :  { %p650_p11 = scmp.ne.s32.totalorder %s59_s20, %s649_s1  ;;  %p655_p13 = scmp.lt.s32.totalorder %s649_s1, %s649_s1 }
  0x1f   :  { %p656_p0 = por %p655_p13, %p654_p12 }
  0x21   :  { %p657_p1 = pnand %p656_p0, %p650_p11 }
  0x23   :  { %660 = shalt.err (!%p657_p1)
}
  0x24   :  { %s762_s28 = smov 64   ;;  %s763_s9 = smov 4  }
  0x25   :  { %64 = dma.hbm_to_vmem [thread:$0]  %s923_s3, 512, %s59_s20, [#allocation9], %s762_s28, %s762_s28, %s763_s9  }
  0x26   :  { %s661_s14 = scalar_lea.hbm %s920_s0, 128 }
  0x27   :  { %p662_p2 = scmp.ne.s32.totalorder %s920_s0, %s661_s14  ;;  %p665_p3 = scmp.lt.u32.totalorder %s661_s14, %s920_s0 }
  0x29   :  { %p667_p4 = pnand %p665_p3, %p662_p2 }
  0x2b   :  { %670 = shalt.err (!%p667_p4)
}
  0x2c   :  { %s671_s23 = scalar_lea.vmem %s23_s22, 128  ;;  %p676_p6 = scmp.lt.s32.totalorder %s23_s22, %s23_s22 }
  0x2d   :  { %p672_p5 = scmp.ne.s32.totalorder %s23_s22, %s671_s23  ;;  %p677_p7 = scmp.lt.s32.totalorder %s671_s23, %s671_s23 }
  0x2f   :  { %p678_p8 = por %p677_p7, %p676_p6 }
  0x31   :  { %p679_p9 = pnand %p678_p8, %p672_p5 }
  0x33   :  { %682 = shalt.err (!%p679_p9)
}
  0x34   :  { %28 = dma.hbm_to_vmem [thread:$0]  %s920_s0, 128, %s23_s22, [#allocation3], %s762_s28, %s762_s28, %s763_s9  }
  0x35   :  { %s764_s24 = smov [#allocation7]   ;;  %s765_s26 = smov [#allocation10]  }
  0x36   :  { %s46_s25 = sshll.u32 %s764_s24, 4  ;;  %s70_s27 = sshll.u32 %s765_s26, 4  ;;  %s47_s25 = int_to_ptr.vmem [resolvable:$true] %s46_s25  ;;  %s71_s27 = int_to_ptr.vmem [resolvable:$true] %s70_s27 }
  0x37   :  { %s683_s1 = scalar_lea.hbm %s922_s2, 128 }
  0x38   :  { %p684_p10 = scmp.ne.s32.totalorder %s922_s2, %s683_s1  ;;  %p687_p11 = scmp.lt.u32.totalorder %s683_s1, %s922_s2 }
  0x3a   :  { %p689_p12 = pnand %p687_p11, %p684_p10 }
  0x3c   :  { %692 = shalt.err (!%p689_p12)
}
  0x3d   :  { %s693_s0 = scalar_lea.vmem %s47_s25, 128  ;;  %p698_p0 = scmp.lt.s32.totalorder %s47_s25, %s47_s25 }
  0x3e   :  { %p694_p13 = scmp.ne.s32.totalorder %s47_s25, %s693_s0  ;;  %p699_p1 = scmp.lt.s32.totalorder %s693_s0, %s693_s0 }
  0x40   :  { %p700_p2 = por %p699_p1, %p698_p0 }
  0x42   :  { %p701_p3 = pnand %p700_p2, %p694_p13 }
  0x44   :  { %704 = shalt.err (!%p701_p3)
}
  0x45   :  { %52 = dma.hbm_to_vmem [thread:$0]  %s922_s2, 128, %s47_s25, [#allocation6], %s762_s28, %s762_s28, %s763_s9  }
  0x46   :  { %s705_s19 = scalar_lea.hbm %s924_s4, 1024 }
  0x47   :  { %p706_p4 = scmp.ne.s32.totalorder %s924_s4, %s705_s19  ;;  %p709_p5 = scmp.lt.u32.totalorder %s705_s19, %s924_s4 }
  0x49   :  { %p711_p6 = pnand %p709_p5, %p706_p4 }
  0x4b   :  { %714 = shalt.err (!%p711_p6)
}
  0x4c   :  { %s715_s24 = scalar_lea.vmem %s71_s27, 1024  ;;  %p720_p8 = scmp.lt.s32.totalorder %s71_s27, %s71_s27 }
  0x4d   :  { %p716_p7 = scmp.ne.s32.totalorder %s71_s27, %s715_s24  ;;  %p721_p9 = scmp.lt.s32.totalorder %s715_s24, %s715_s24 }
  0x4f   :  { %p722_p10 = por %p721_p9, %p720_p8 }
  0x51   :  { %p723_p11 = pnand %p722_p10, %p716_p7 }
  0x53   :  { %726 = shalt.err (!%p723_p11)
}
  0x54   :  { %76 = dma.hbm_to_vmem [thread:$0]  %s924_s4, 1024, %s71_s27, [#allocation9], %s758_s15, %s758_s15, %s759_s16  }
  0x55   :  { %749 = dma.done.wait [#allocation3], 128  }
  0x56   :  { %750 = vsyncadd [#allocation3], 4294967168 }
  0x57   :  { %751 = dma.done.wait [#allocation6], 384  }
  0x58   :  { %752 = vsyncadd [#allocation6], 4294966912 }
  0x59   :  { %753 = dma.done.wait [#allocation9], 1536  }
  0x5a   :  { %754 = vsyncadd [#allocation9], 4294965760  ;;  %v766_v0 = vmov 0.0   ;;  %vm767_vm0 = vmmov 0   ;;  %v607_v1 = vld [vmem:[#allocation2] sm:$0xff]   ;;  %v608_v2 = vld [vmem:[#allocation7] sm:$0xff]  }
  0x5b   :  { %507 = vmatprep.subr.bf16.mxu0 %v766_v0  ;;  %509 = vmatprep.mubr.msk.bf16.mxu0 %vm767_vm0, %v766_v0  ;;  %vm118_vm1 = vcmask 130048   ;;  %v609_v3 = vld [vmem:[#allocation8] sm:$0xff]   ;;  %v610_v4 = vld [vmem:[#allocation8 + $0x8] sm:$0xff]   ;;  %v611_v5 = vld [vmem:[#allocation8 + $0x10] sm:$0xff]   ;;  %vm203_vm2 = vcmask 523264   ;;  %s768_s29 = smov [#allocation11]  }
  0x5c   :  { %513 = vmatprep.subr.bf16.mxu1 %v766_v0  ;;  %521 = vmatprep.mubr.msk.bf16.mxu1 %vm767_vm0, %v766_v0  ;;  %v612_v6 = vld [vmem:[#allocation8 + $0x18] sm:$0xff]   ;;  %v248_v7 = vld [vmem:[#allocation10] sm:$0xff]  ;;  %v249_v8 = vld [vmem:[#allocation10 + $0x8] sm:$0xff]  ;;  %s451_s30 = sshll.u32 %s768_s29, 4  ;;  %s452_s30 = int_to_ptr.vmem [resolvable:$true] %s451_s30 }
  0x5d   :  { %508 = vmatpush3.bf16.msra.mxu0 %v607_v1  ;;  %514 = vmatpush3.bf16.msra.mxu1 %v609_v3  ;;  %v250_v9 = vld [vmem:[#allocation10 + $0x10] sm:$0xff]  ;;  %v563_v10 = vpack.c.bf16 %v249_v8, %v248_v7  ;;  %v251_v11 = vld [vmem:[#allocation10 + $0x18] sm:$0xff]  ;;  %v252_v13 = vld [vmem:[#allocation10 + $0x20] sm:$0xff]  ;;  %s727_s1 = scalar_lea.vmem %s452_s30, 256  ;;  %p732_p13 = scmp.lt.s32.totalorder %s452_s30, %s452_s30 }
  0x5e   :  { %515 = vmatprep.subr.bf16.mxu1 %v766_v0  ;;  %v567_v12 = vpack.c.bf16 %v251_v11, %v250_v9  ;;  %v253_v14 = vld [vmem:[#allocation10 + $0x28] sm:$0xff]  ;;  %v104_v17 = vld [vmem:[#allocation5 + $0x8] sm:$0xff]  ;;  %v255_v28 = vld [vmem:[#allocation10 + $0x38] sm:$0xff]  ;;  %p728_p12 = scmp.ne.s32.totalorder %s452_s30, %s727_s1  ;;  %p733_p0 = scmp.lt.s32.totalorder %s727_s1, %s727_s1 }
  0x5f   :  { %564 = vmatprep.subr.bf16.mxu0 %v563_v10  ;;  %v571_v15 = vpack.c.bf16 %v253_v14, %v252_v13  ;;  %v103_v16 = vld [vmem:[#allocation5] sm:$0xff]  ;;  %v106_v19 = vmul.f32 0.1, %v104_v17  ;;  %v254_v27 = vld [vmem:[#allocation10 + $0x30] sm:$0xff]  ;;  %v468_v30 = vld [vmem:[%s925_s5] ss:$0 sm:$0xff] }
  0x60   :  { %510 = vmatmul.mubr.msk.bf16.vlgmr.msra.gmra.mrb[0].mxu0 %vm118_vm1, %v608_v2  ;;  %v105_v18 = vmul.f32 0.1, %v103_v16  ;;  %v575_v29 = vpack.c.bf16 %v255_v28, %v254_v27  ;;  %v478_v48 = vld [vmem:[%s926_s6] ss:$0 sm:$0xff]  ;;  %p734_p1 = por %p733_p0, %p732_p13 }
  0x61   :  { %516 = vmatpush3.bf16.msra.mxu1 %v610_v4  ;;  %566 = vmatpush3.bf16.msra.mxu0 %v563_v10  ;;  %v479_v52 = vld [vmem:[%s927_s7] ss:$0 sm:$0xff] }
  0x62   :  { %517 = vmatprep.subr.bf16.mxu1 %v766_v0  ;;  %568 = vmatprep.subr.bf16.mxu0 %v567_v12  ;;  %p735_p2 = pnand %p734_p1, %p728_p12 }
  0x65   :  { %518 = vmatpush3.bf16.msra.mxu1 %v611_v5  ;;  %570 = vmatpush3.bf16.msra.mxu0 %v567_v12 }
  0x66   :  { %519 = vmatprep.subr.bf16.mxu1 %v766_v0  ;;  %572 = vmatprep.subr.bf16.mxu0 %v571_v15 }
  0x69   :  { %520 = vmatpush3.bf16.msra.mxu1 %v612_v6  ;;  %574 = vmatpush3.bf16.msra.mxu0 %v571_v15 }
  0x6a   :  { %580 = vmatprep.subr.bf16.mxu1 %v563_v10  ;;  %576 = vmatprep.subr.bf16.mxu0 %v575_v29 }
  0x6d   :  { %578 = vmatpush3.bf16.msra.mxu0 %v575_v29 }
 0x133   :  { %v156_v20 = vpop.f32.mrb[0].mxu0 }
 0x134   :  { %v511_v21 = vpop.f32.mrb[1].mxu0  ;;  %v157_v23 = vadd.f32 %v156_v20, %v105_v18 }
 0x135   :  { %v159_v22 = vpop.f32.mrb[2].mxu0 }
 0x136   :  { %v160_v24 = vadd.f32 %v159_v22, %v106_v19  ;;  %v512_v25 = vpop.f32.mrb[3].mxu0 }
 0x138   :  { %v163_v26 = vpack.c.bf16 %v160_v24, %v157_v23 }
 0x13a   :  { %522 = vmatmul.mubr.msk.bf16.vlgmr.msra.gmra.mrb[0].mxu1 %vm203_vm2, %v163_v26 }
 0x13b   :  { %582 = vmatpush3.bf16.msra.mxu1 %v563_v10 }
 0x13c   :  { %584 = vmatprep.subr.bf16.mxu1 %v567_v12 }
 0x13f   :  { %586 = vmatpush3.bf16.msra.mxu1 %v567_v12 }
 0x140   :  { %588 = vmatprep.subr.bf16.mxu1 %v571_v15 }
 0x143   :  { %590 = vmatpush3.bf16.msra.mxu1 %v571_v15 }
 0x144   :  { %592 = vmatprep.subr.bf16.mxu1 %v575_v29 }
 0x147   :  { %594 = vmatpush3.bf16.msra.mxu1 %v575_v29 }
 0x20d   :  { %v241_v31 = vpop.f32.mrb[0].mxu1 }
 0x20e   :  { %v242_v32 = vadd.f32 %v468_v30, %v241_v31  ;;  %v523_v33 = vpop.f32.mrb[1].mxu1 }
 0x20f   :  { %v244_v34 = vpop.f32.mrb[2].mxu1 }
 0x210   :  { %v245_v35 = vadd.f32 %v468_v30, %v244_v34  ;;  %v524_v36 = vpop.f32.mrb[3].mxu1  ;;  %541 = vmatprep.mubr.msk.f32.mxu0 %vm203_vm2, %v242_v32 }
 0x212   :  { %542 = vmatmul.mubr.msk.f32.vlgmr.msra.gmra.mrb[4].mxu0 %vm203_vm2, %v245_v35 }
 0x2e5   :  { %v543_v37 = vpop.f32.mrb[4].mxu0 }
 0x2e6   :  { %v338_v38 = vsub.f32 %v245_v35, %v543_v37  ;;  %v328_v39 = vpop.f32.mrb[5].mxu0 }
 0x2e7   :  { %v337_v40 = vsub.f32 %v242_v32, %v328_v39 }
 0x2e8   :  { %v340_v42 = vmul.f32 %v338_v38, %v338_v38 }
 0x2e9   :  { %v339_v41 = vmul.f32 %v337_v40, %v337_v40 }
 0x2eb   :  { %560 = vmatprep.mubr.msk.f32.mxu1 %vm203_vm2, %v339_v41 }
 0x2ec   :  { %561 = vmatmul.mubr.msk.f32.vlgmr.msra.gmra.mrb[4].mxu1 %vm203_vm2, %v340_v42 }
 0x3bf   :  { %v562_v43 = vpop.f32.mrb[4].mxu1 }
 0x3c0   :  { %v419_v44 = vadd.f32 1e-05, %v562_v43  ;;  %v413_v45 = vpop.f32.mrb[5].mxu1 }
 0x3c1   :  { %v414_v46 = vadd.f32 1e-05, %v413_v45 }
 0x3c2   :  { %613 = vrsqrt.f32 %v419_v44 }
 0x3c3   :  { %615 = vrsqrt.f32 %v414_v46 }
 0x3cc   :  { %v614_v47 = vpop.eup %613 }
 0x3cd   :  { %v616_v49 = vpop.eup %615  ;;  %v425_v50 = vmul.f32 %v614_v47, %v338_v38 }
 0x3ce   :  { %v424_v51 = vmul.f32 %v616_v49, %v337_v40 }
 0x3cf   :  { %v434_v53 = vmul.f32 %v478_v48, %v425_v50 }
 0x3d0   :  { %v433_v54 = vmul.f32 %v478_v48, %v424_v51 }
 0x3d1   :  { %v443_v55 = vadd.f32 %v479_v52, %v434_v53 }
 0x3d2   :  { %v442_v56 = vadd.f32 %v479_v52, %v433_v54 }
 0x3d3   :  { %445 = vst.msk [vmem:[#allocation11 + $0x8] sm:$0xff] %vm203_vm2, %v443_v55 }
 0x3d4   :  { %444 = vst.msk [vmem:[#allocation11] sm:$0xff] %vm203_vm2, %v442_v56 }
 0x3d5   :  { %738 = shalt.err (!%p735_p2)
}
 0x3d6   :  { %s739_s10 = scalar_lea.hbm %s928_s8, 256 }
 0x3d7   :  { %p740_p3 = scmp.ne.s32.totalorder %s928_s8, %s739_s10  ;;  %p743_p4 = scmp.lt.u32.totalorder %s739_s10, %s928_s8 }
 0x3d9   :  { %p745_p5 = pnand %p743_p4, %p740_p3 }
 0x3db   :  { %748 = shalt.err (!%p745_p5)
}
 0x3dc   :  { %457 = dma.vmem_to_hbm [thread:$0]  %s452_s30, 256, %s928_s8, [#allocation4], %s758_s15, %s758_s15, %s759_s16  }
 0x3dd   :  { %755 = dma.done.wait [#allocation4], 256  }
 0x3de   :  { %756 = vsyncadd [#allocation4], 4294967040 }
 0x3df   :  { %461 = vsyncpa [#allocation3], 1 }
 0x3e0   :  { %462 = vsyncpa [#allocation6], 1 }
 0x3e1   :  { %463 = vsyncpa [#allocation9], 1 }
 0x3e2   :  { %464 = vsyncpa [#allocation4], 1 }

</bundles_post_ra>
